<compile_context>
chip_gen: v5e
topology: v5e:2x2
jax: 0.10.0
libtpu: 0.0.40
codegen_flags: <defaults>
</compile_context>

<pallas_src>
import jax
import jax.numpy as jnp
from jax.experimental import pallas as pl
from jax.experimental.pallas import tpu as pltpu

LANE = 128   # lane width (last dim)
SUB = 8      # sublane granularity (second-to-last dim)
MIB = 1024 * 1024


def _rup(n, m):
    return ((n + m - 1) // m) * m


def _pad_to(a, shape):
    pads = [(0, t - s) for s, t in zip(a.shape, shape)]
    if any(p[1] for p in pads):
        return jnp.pad(a, pads)
    return a


def _physical_vmem_bytes():
    """Per-generation physical VMEM (v5e/v6e: 128 MiB, v7x: 64 MiB)."""
    try:
        return int(pltpu.get_tpu_info().vmem_capacity_bytes)
    except Exception:
        pass
    try:
        kind = jax.devices()[0].device_kind.lower()
        if any(t in kind for t in ("v4", "v5", "v6")):
            return 128 * MIB
    except Exception:
        pass
    return 64 * MIB  # conservative (v7x)


def _mlp_kernel(x_ref, w1_ref, b1_ref, w2_ref, b2_ref, w3_ref, b3_ref, o_ref):
    cdt = w1_ref.dtype
    # Cast x -> compute dtype in-register (cheap VPU op hidden under the MXU);
    # avoids a wrapper-side HBM pad/cast round trip of x.
    h1 = jnp.dot(x_ref[...].astype(cdt), w1_ref[...],
                 preferred_element_type=jnp.float32)
    h1 = jnp.maximum(h1 + b1_ref[...], 0.0)
    h2 = jnp.dot(h1.astype(cdt), w2_ref[...],
                 preferred_element_type=jnp.float32)
    h2 = jnp.maximum(h2 + b2_ref[...], 0.0)
    out = jnp.dot(h2.astype(cdt), w3_ref[...],
                  preferred_element_type=jnp.float32) + b3_ref[...]
    o_ref[...] = out.astype(o_ref.dtype)


def prepare_params(params, compute_dtype=jnp.bfloat16):
    """Pad/cast the weights ONCE; cache the result next to the model params.

    Output feature dims (H, 2H, D_out) are zero-padded to multiples of 128 so every
    store is lane-dense.  D_in is left untouched (x / w1 blocks cover the full array,
    so the (8,128) rule is satisfied without ever copying x in HBM).  Weights are
    cast to `compute_dtype` for the MXU; biases stay f32 so bias-add/ReLU are exact.
    """
    # TODO(synk): for weight-streaming-bound v5e/v6e deployments, int8 weights halve
    # HBM traffic again (their MXU accepts int8); do NOT port that to v7x (fp8 only).
    D_in, H = params["w1"].shape
    H2 = params["w2"].shape[1]
    D_out = params["w3"].shape[1]
    H_p, H2_p, D_out_p = (_rup(d, LANE) for d in (H, H2, D_out))
    return dict(
        w1=_pad_to(params["w1"], (D_in, H_p)).astype(compute_dtype),
        w2=_pad_to(params["w2"], (H_p, H2_p)).astype(compute_dtype),
        w3=_pad_to(params["w3"], (H2_p, D_out_p)).astype(compute_dtype),
        b1=_pad_to(params["b1"].reshape(1, -1), (1, H_p)).astype(jnp.float32),
        b2=_pad_to(params["b2"].reshape(1, -1), (1, H2_p)).astype(jnp.float32),
        b3=_pad_to(params["b3"].reshape(1, -1), (1, D_out_p)).astype(jnp.float32),
        d_out=D_out,
    )


def variable_encoder_forward(x, prepared, *, block_b=None, out_dtype=None):
    """x: [B, D_in].  prepared: output of prepare_params()."""
    B, D_in = x.shape
    w1, b1 = prepared["w1"], prepared["b1"]
    w2, b2 = prepared["w2"], prepared["b2"]
    w3, b3 = prepared["w3"], prepared["b3"]
    D_out = prepared["d_out"]
    assert w1.shape[0] == D_in, "x feature dim does not match prepared w1"
    H_p, H2_p, D_out_p = w1.shape[1], w2.shape[1], w3.shape[1]

    compute_dtype = w1.dtype
    if out_dtype is None:
        # NOTE: if x arrives in bf16, the fc3 result is rounded to bf16 on store.
        out_dtype = x.dtype

    x_item = jnp.dtype(x.dtype).itemsize
    out_item = jnp.dtype(out_dtype).itemsize
    c_item = jnp.dtype(compute_dtype).itemsize

    # Weights/biases are single-buffered (pl.Buffered(1)) -> counted once.
    w_bytes = (w1.size + w2.size + w3.size) * c_item
    b_bytes = (b1.size + b2.size + b3.size) * 4

    def need_bytes(blk):
        io = 2 * blk * D_in * x_item + 2 * blk * D_out_p * out_item  # double-buffered x/out
        act_f32 = blk * (H_p + H2_p + D_out_p) * 4                   # f32 h1, h2, out
        act_cast = blk * (D_in + H_p + H2_p) * c_item                # bf16 copies from astype
        return w_bytes + b_bytes + io + act_f32 + act_cast

    phys_vmem = _physical_vmem_bytes()
    budget = int(0.75 * phys_vmem)   # ~96 MiB on v5e/v6e, ~48 MiB on v7x

    # Sub-32-bit dtypes pack two rows per sublane -> round small-batch tiles to 16.
    sub_gran = 16 if min(x_item, out_item) < 4 else SUB
    if block_b is None:
        if B >= 512:
            block_b = 512
        elif B >= 256:
            block_b = 256
        else:
            block_b = _rup(B, sub_gran)
        # Shrink the tile until it (plus resident weights) fits the per-gen budget.
        while (need_bytes(block_b) > budget and block_b % 16 == 0
               and block_b // 2 >= sub_gran):
            block_b //= 2
    # TODO(synk): if the resident weights alone exceed the budget (large hidden sizes,
    # need_bytes(sub_gran) > budget), split into two pallas_calls (fc1+fc2 emitting bf16
    # h2, then fc3) or add an N/K grid axis instead of keeping all weights resident.

    B_p = _rup(B, block_b)
    grid_steps = B_p // block_b
    # v7x megacore: ensure >=2 steps on the "parallel" axis so both TensorCores get
    # work (harmless on 1-TC chips: per-step overhead ~0.35 us).
    if grid_steps == 1 and block_b % (2 * SUB) == 0 and block_b >= 2 * sub_gran:
        block_b //= 2
        grid_steps = B_p // block_b

    # Only touches HBM when batch padding is actually required; dtype untouched.
    x_in = _pad_to(x, (B_p, D_in))

    vmem_limit = int(min(max(int(1.3 * need_bytes(block_b)), 32 * MIB), budget))

    flops = 2 * B_p * (D_in * H_p + H_p * H2_p + H2_p * D_out_p)
    bytes_accessed = (B_p * D_in * x_item + w_bytes + b_bytes
                      + B_p * D_out_p * out_item)
    cost = pl.CostEstimate(flops=flops, transcendentals=0,
                           bytes_accessed=bytes_accessed)

    def run(single_buffer_weights):
        def const_spec(shape):
            idx = lambda i: (0,) * len(shape)
            if single_buffer_weights:
                # Constant index map: the block never changes across the batch grid,
                # so double-buffering would only double VMEM residency.
                return pl.BlockSpec(shape, idx, pipeline_mode=pl.Buffered(1))
            return pl.BlockSpec(shape, idx)

        return pl.pallas_call(
            _mlp_kernel,
            out_shape=jax.ShapeDtypeStruct((B_p, D_out_p), out_dtype),
            grid_spec=pltpu.PrefetchScalarGridSpec(
                num_scalar_prefetch=0,
                grid=(grid_steps,),
                in_specs=[
                    pl.BlockSpec((block_b, D_in), lambda i: (i, 0)),  # x tile (orig dtype)
                    const_spec(w1.shape),
                    const_spec(b1.shape),
                    const_spec(w2.shape),
                    const_spec(b2.shape),
                    const_spec(w3.shape),
                    const_spec(b3.shape),
                ],
                out_specs=pl.BlockSpec((block_b, D_out_p), lambda i: (i, 0)),
            ),
            compiler_params=pltpu.CompilerParams(
                dimension_semantics=("parallel",),
                vmem_limit_bytes=vmem_limit,
            ),
            cost_estimate=cost,
        )(x_in, w1, b1, w2, b2, w3, b3)

    try:
        out_padded = run(True)
    except Exception:
        # Fallback for Pallas versions that reject pipeline_mode=Buffered(1):
        # double-buffered weights are a VMEM-residency regression, not a correctness one.
        out_padded = run(False)

    # Strip batch / lane padding.
    return out_padded[:B, :D_out]


def init_params(key, input_size, hidden_size, output_size, dtype=jnp.float32):
    """Deterministic synthetic init matching the PyTorch module's shapes."""
    ks = jax.random.split(key, 6)

    def lin(kw, kb, fan_in, fan_out):
        bound = 1.0 / jnp.sqrt(fan_in)
        w = jax.random.uniform(kw, (fan_in, fan_out), dtype, -bound, bound)
        b = jax.random.uniform(kb, (fan_out,), dtype, -bound, bound)
        return w, b

    w1, b1 = lin(ks[0], ks[1], input_size, hidden_size)
    w2, b2 = lin(ks[2], ks[3], hidden_size, 2 * hidden_size)
    w3, b3 = lin(ks[4], ks[5], 2 * hidden_size, output_size)
    return dict(w1=w1, b1=b1, w2=w2, b2=b2, w3=w3, b3=b3)


def _reference_f32(x, p):
    hp = jax.lax.Precision.HIGHEST
    h1 = jnp.maximum(jnp.dot(x, p["w1"], precision=hp) + p["b1"][None, :], 0.0)
    h2 = jnp.maximum(jnp.dot(h1, p["w2"], precision=hp) + p["b2"][None, :], 0.0)
    return jnp.dot(h2, p["w3"], precision=hp) + p["b3"][None, :]


def _reference_bf16(x, p):
    """Emulates the kernel's bf16-operand / f32-accumulate arithmetic exactly."""
    r = lambda v: v.astype(jnp.bfloat16).astype(jnp.float32)
    hp = jax.lax.Precision.HIGHEST
    h1 = jnp.maximum(jnp.dot(r(x), r(p["w1"]), precision=hp) + p["b1"][None, :], 0.0)
    h2 = jnp.maximum(jnp.dot(r(h1), r(p["w2"]), precision=hp) + p["b2"][None, :], 0.0)
    return jnp.dot(r(h2), r(p["w3"]), precision=hp) + p["b3"][None, :]


if __name__ == "__main__":
    # Small config consistent with the module: input_size=16, hidden_size=32
    # (so fc2 out = 64), output_size=24, batch=8.
    # NOTE: at this size the kernel is launch-overhead dominated; it exists to prove
    # correctness — the tiling/padding/residency scheme is what matters at scale.
    key = jax.random.PRNGKey(0)
    k_x, k_p = jax.random.split(key)

    B, D_in, H, D_out = 8, 16, 32, 24
    x = jax.random.normal(k_x, (B, D_in), jnp.float32)
    params = init_params(k_p, D_in, H, D_out)
    prepared = prepare_params(params)   # pad/cast weights once; cache with the params

    out = variable_encoder_forward(x, prepared)
    out = jax.block_until_ready(out)

    assert out.shape == (B, D_out)

    ref_bf16 = _reference_bf16(x, params)
    ref_f32 = _reference_f32(x, params)
    # Tight check vs bf16-emulating reference (same arithmetic as the kernel).
    assert jnp.allclose(out, ref_bf16, atol=2e-3, rtol=2e-3), "mismatch vs bf16 reference"
    # Loose sanity check vs full-f32 reference.
    assert jnp.allclose(out, ref_f32, atol=1e-1, rtol=1e-1), "mismatch vs f32 reference"

    print("KERNEL_OK")
</pallas_src>

<mosaic_0001>
module attributes {stable_mosaic.version = 11 : i64} {
  func.func @_mlp_kernel(%arg0: i32, %arg1: memref<8x16xf32, #tpu.memory_space<vmem>>, %arg2: memref<16x128xbf16, #tpu.memory_space<vmem>>, %arg3: memref<1x128xf32, #tpu.memory_space<vmem>>, %arg4: memref<128x128xbf16, #tpu.memory_space<vmem>>, %arg5: memref<1x128xf32, #tpu.memory_space<vmem>>, %arg6: memref<128x128xbf16, #tpu.memory_space<vmem>>, %arg7: memref<1x128xf32, #tpu.memory_space<vmem>>, %arg8: memref<8x128xf32, #tpu.memory_space<vmem>>) attributes {dimension_semantics = [#tpu.dimension_semantics<parallel>], iteration_bounds = array<i64: 1>, scalar_prefetch = 0 : i64, scratch_operands = 0 : i64, tpu.core_type = #tpu.core_type<tc>, window_params = [{transform_indices = @transform_0, window_bounds = array<i64: 8, 16>}, {pipeline_mode = #tpu.pipeline_mode<synchronous>, transform_indices = @transform_1, window_bounds = array<i64: 16, 128>}, {pipeline_mode = #tpu.pipeline_mode<synchronous>, transform_indices = @transform_2, window_bounds = array<i64: 1, 128>}, {pipeline_mode = #tpu.pipeline_mode<synchronous>, transform_indices = @transform_3, window_bounds = array<i64: 128, 128>}, {pipeline_mode = #tpu.pipeline_mode<synchronous>, transform_indices = @transform_4, window_bounds = array<i64: 1, 128>}, {pipeline_mode = #tpu.pipeline_mode<synchronous>, transform_indices = @transform_5, window_bounds = array<i64: 128, 128>}, {pipeline_mode = #tpu.pipeline_mode<synchronous>, transform_indices = @transform_6, window_bounds = array<i64: 1, 128>}, {transform_indices = @transform_7, window_bounds = array<i64: 8, 128>}]} {
    %c0 = arith.constant 0 : index
    %c0_0 = arith.constant 0 : index
    %0 = vector.load %arg1[%c0, %c0_0] : memref<8x16xf32, #tpu.memory_space<vmem>>, vector<8x16xf32>
    %1 = arith.truncf %0 : vector<8x16xf32> to vector<8x16xbf16>
    %c0_1 = arith.constant 0 : index
    %c0_2 = arith.constant 0 : index
    %2 = vector.load %arg2[%c0_1, %c0_2] : memref<16x128xbf16, #tpu.memory_space<vmem>>, vector<16x128xbf16>
    %cst = arith.constant dense<0.000000e+00> : vector<8x128xf32>
    %3 = tpu.matmul %1, %2, %cst {dimension_numbers = #tpu.dot_dimension_numbers<[1], [0], [0], [1], [0, 0, 1, 1], [], []>} : vector<8x16xbf16>, vector<16x128xbf16>, vector<8x128xf32> -> vector<8x128xf32>
    %c0_3 = arith.constant 0 : index
    %c0_4 = arith.constant 0 : index
    %4 = vector.load %arg3[%c0_3, %c0_4] : memref<1x128xf32, #tpu.memory_space<vmem>>, vector<1x128xf32>
    %5 = vector.broadcast %4 : vector<1x128xf32> to vector<8x128xf32>
    %6 = arith.addf %3, %5 : vector<8x128xf32>
    %cst_5 = arith.constant 0.000000e+00 : f32
    %7 = vector.broadcast %cst_5 : f32 to vector<8x128xf32>
    %8 = arith.maximumf %6, %7 : vector<8x128xf32>
    %9 = arith.truncf %8 : vector<8x128xf32> to vector<8x128xbf16>
    %c0_6 = arith.constant 0 : index
    %c0_7 = arith.constant 0 : index
    %10 = vector.load %arg4[%c0_6, %c0_7] : memref<128x128xbf16, #tpu.memory_space<vmem>>, vector<128x128xbf16>
    %cst_8 = arith.constant dense<0.000000e+00> : vector<8x128xf32>
    %11 = tpu.matmul %9, %10, %cst_8 {dimension_numbers = #tpu.dot_dimension_numbers<[1], [0], [0], [1], [0, 0, 1, 1], [], []>} : vector<8x128xbf16>, vector<128x128xbf16>, vector<8x128xf32> -> vector<8x128xf32>
    %c0_9 = arith.constant 0 : index
    %c0_10 = arith.constant 0 : index
    %12 = vector.load %arg5[%c0_9, %c0_10] : memref<1x128xf32, #tpu.memory_space<vmem>>, vector<1x128xf32>
    %13 = vector.broadcast %12 : vector<1x128xf32> to vector<8x128xf32>
    %14 = arith.addf %11, %13 : vector<8x128xf32>
    %cst_11 = arith.constant 0.000000e+00 : f32
    %15 = vector.broadcast %cst_11 : f32 to vector<8x128xf32>
    %16 = arith.maximumf %14, %15 : vector<8x128xf32>
    %17 = arith.truncf %16 : vector<8x128xf32> to vector<8x128xbf16>
    %c0_12 = arith.constant 0 : index
    %c0_13 = arith.constant 0 : index
    %18 = vector.load %arg6[%c0_12, %c0_13] : memref<128x128xbf16, #tpu.memory_space<vmem>>, vector<128x128xbf16>
    %cst_14 = arith.constant dense<0.000000e+00> : vector<8x128xf32>
    %19 = tpu.matmul %17, %18, %cst_14 {dimension_numbers = #tpu.dot_dimension_numbers<[1], [0], [0], [1], [0, 0, 1, 1], [], []>} : vector<8x128xbf16>, vector<128x128xbf16>, vector<8x128xf32> -> vector<8x128xf32>
    %c0_15 = arith.constant 0 : index
    %c0_16 = arith.constant 0 : index
    %20 = vector.load %arg7[%c0_15, %c0_16] : memref<1x128xf32, #tpu.memory_space<vmem>>, vector<1x128xf32>
    %21 = vector.broadcast %20 : vector<1x128xf32> to vector<8x128xf32>
    %22 = arith.addf %19, %21 : vector<8x128xf32>
    %c0_17 = arith.constant 0 : index
    %c0_18 = arith.constant 0 : index
    %23 = vector.load %arg8[%c0_17, %c0_18] : memref<8x128xf32, #tpu.memory_space<vmem>>, vector<8x128xf32>
    tpu.vector_store %arg8[%c0_17, %c0_18], %22 {strides = array<i32>} : memref<8x128xf32, #tpu.memory_space<vmem>>, vector<8x128xf32>,
    return
  }
  func.func @transform_0(%arg0: i32) -> (i32, i32) {
    %c0_i32 = arith.constant 0 : i32
    %c0_i32_0 = arith.constant 0 : i32
    return %arg0, %c0_i32 : i32, i32
  }
  func.func @transform_1(%arg0: i32) -> (i32, i32) {
    %c0_i32 = arith.constant 0 : i32
    %c0_i32_0 = arith.constant 0 : i32
    %c0_i32_1 = arith.constant 0 : i32
    return %c0_i32, %c0_i32_0 : i32, i32
  }
  func.func @transform_2(%arg0: i32) -> (i32, i32) {
    %c0_i32 = arith.constant 0 : i32
    %c0_i32_0 = arith.constant 0 : i32
    %c0_i32_1 = arith.constant 0 : i32
    return %c0_i32, %c0_i32_0 : i32, i32
  }
  func.func @transform_3(%arg0: i32) -> (i32, i32) {
    %c0_i32 = arith.constant 0 : i32
    %c0_i32_0 = arith.constant 0 : i32
    %c0_i32_1 = arith.constant 0 : i32
    return %c0_i32, %c0_i32_0 : i32, i32
  }
  func.func @transform_4(%arg0: i32) -> (i32, i32) {
    %c0_i32 = arith.constant 0 : i32
    %c0_i32_0 = arith.constant 0 : i32
    %c0_i32_1 = arith.constant 0 : i32
    return %c0_i32, %c0_i32_0 : i32, i32
  }
  func.func @transform_5(%arg0: i32) -> (i32, i32) {
    %c0_i32 = arith.constant 0 : i32
    %c0_i32_0 = arith.constant 0 : i32
    %c0_i32_1 = arith.constant 0 : i32
    return %c0_i32, %c0_i32_0 : i32, i32
  }
  func.func @transform_6(%arg0: i32) -> (i32, i32) {
    %c0_i32 = arith.constant 0 : i32
    %c0_i32_0 = arith.constant 0 : i32
    %c0_i32_1 = arith.constant 0 : i32
    return %c0_i32, %c0_i32_0 : i32, i32
  }
  func.func @transform_7(%arg0: i32) -> (i32, i32) {
    %c0_i32 = arith.constant 0 : i32
    %c0_i32_0 = arith.constant 0 : i32
    return %arg0, %c0_i32 : i32, i32
  }
}

module attributes {stable_mosaic.version = 11 : i64} {
  func.func @_mlp_kernel(%arg0: i32, %arg1: memref<8x16xf32, #tpu.memory_space<vmem>>, %arg2: memref<16x128xbf16, #tpu.memory_space<vmem>>, %arg3: memref<1x128xf32, #tpu.memory_space<vmem>>, %arg4: memref<128x128xbf16, #tpu.memory_space<vmem>>, %arg5: memref<1x128xf32, #tpu.memory_space<vmem>>, %arg6: memref<128x128xbf16, #tpu.memory_space<vmem>>, %arg7: memref<1x128xf32, #tpu.memory_space<vmem>>, %arg8: memref<8x128xf32, #tpu.memory_space<vmem>>) attributes {dimension_semantics = [#tpu.dimension_semantics<parallel>], iteration_bounds = array<i64: 1>, scalar_prefetch = 0 : i64, scratch_operands = 0 : i64, tpu.core_type = #tpu.core_type<tc>, window_params = [{transform_indices = @transform_0, window_bounds = array<i64: 8, 16>}, {pipeline_mode = #tpu.pipeline_mode<synchronous>, transform_indices = @transform_1, window_bounds = array<i64: 16, 128>}, {pipeline_mode = #tpu.pipeline_mode<synchronous>, transform_indices = @transform_2, window_bounds = array<i64: 1, 128>}, {pipeline_mode = #tpu.pipeline_mode<synchronous>, transform_indices = @transform_3, window_bounds = array<i64: 128, 128>}, {pipeline_mode = #tpu.pipeline_mode<synchronous>, transform_indices = @transform_4, window_bounds = array<i64: 1, 128>}, {pipeline_mode = #tpu.pipeline_mode<synchronous>, transform_indices = @transform_5, window_bounds = array<i64: 128, 128>}, {pipeline_mode = #tpu.pipeline_mode<synchronous>, transform_indices = @transform_6, window_bounds = array<i64: 1, 128>}, {transform_indices = @transform_7, window_bounds = array<i64: 8, 128>}]} {
    %c0 = arith.constant 0 : index
    %c0_0 = arith.constant 0 : index
    %0 = vector.load %arg1[%c0, %c0_0] : memref<8x16xf32, #tpu.memory_space<vmem>>, vector<8x16xf32>
    %1 = arith.truncf %0 : vector<8x16xf32> to vector<8x16xbf16>
    %c0_1 = arith.constant 0 : index
    %c0_2 = arith.constant 0 : index
    %2 = vector.load %arg2[%c0_1, %c0_2] : memref<16x128xbf16, #tpu.memory_space<vmem>>, vector<16x128xbf16>
    %cst = arith.constant dense<0.000000e+00> : vector<8x128xf32>
    %3 = tpu.matmul %1, %2, %cst {dimension_numbers = #tpu.dot_dimension_numbers<[1], [0], [0], [1], [0, 0, 1, 1], [], []>} : vector<8x16xbf16>, vector<16x128xbf16>, vector<8x128xf32> -> vector<8x128xf32>
    %c0_3 = arith.constant 0 : index
    %c0_4 = arith.constant 0 : index
    %4 = vector.load %arg3[%c0_3, %c0_4] : memref<1x128xf32, #tpu.memory_space<vmem>>, vector<1x128xf32>
    %5 = vector.broadcast %4 : vector<1x128xf32> to vector<8x128xf32>
    %6 = arith.addf %3, %5 : vector<8x128xf32>
    %cst_5 = arith.constant 0.000000e+00 : f32
    %7 = vector.broadcast %cst_5 : f32 to vector<8x128xf32>
    %8 = arith.maximumf %6, %7 : vector<8x128xf32>
    %9 = arith.truncf %8 : vector<8x128xf32> to vector<8x128xbf16>
    %c0_6 = arith.constant 0 : index
    %c0_7 = arith.constant 0 : index
    %10 = vector.load %arg4[%c0_6, %c0_7] : memref<128x128xbf16, #tpu.memory_space<vmem>>, vector<128x128xbf16>
    %cst_8 = arith.constant dense<0.000000e+00> : vector<8x128xf32>
    %11 = tpu.matmul %9, %10, %cst_8 {dimension_numbers = #tpu.dot_dimension_numbers<[1], [0], [0], [1], [0, 0, 1, 1], [], []>} : vector<8x128xbf16>, vector<128x128xbf16>, vector<8x128xf32> -> vector<8x128xf32>
    %c0_9 = arith.constant 0 : index
    %c0_10 = arith.constant 0 : index
    %12 = vector.load %arg5[%c0_9, %c0_10] : memref<1x128xf32, #tpu.memory_space<vmem>>, vector<1x128xf32>
    %13 = vector.broadcast %12 : vector<1x128xf32> to vector<8x128xf32>
    %14 = arith.addf %11, %13 : vector<8x128xf32>
    %cst_11 = arith.constant 0.000000e+00 : f32
    %15 = vector.broadcast %cst_11 : f32 to vector<8x128xf32>
    %16 = arith.maximumf %14, %15 : vector<8x128xf32>
    %17 = arith.truncf %16 : vector<8x128xf32> to vector<8x128xbf16>
    %c0_12 = arith.constant 0 : index
    %c0_13 = arith.constant 0 : index
    %18 = vector.load %arg6[%c0_12, %c0_13] : memref<128x128xbf16, #tpu.memory_space<vmem>>, vector<128x128xbf16>
    %cst_14 = arith.constant dense<0.000000e+00> : vector<8x128xf32>
    %19 = tpu.matmul %17, %18, %cst_14 {dimension_numbers = #tpu.dot_dimension_numbers<[1], [0], [0], [1], [0, 0, 1, 1], [], []>} : vector<8x128xbf16>, vector<128x128xbf16>, vector<8x128xf32> -> vector<8x128xf32>
    %c0_15 = arith.constant 0 : index
    %c0_16 = arith.constant 0 : index
    %20 = vector.load %arg7[%c0_15, %c0_16] : memref<1x128xf32, #tpu.memory_space<vmem>>, vector<1x128xf32>
    %21 = vector.broadcast %20 : vector<1x128xf32> to vector<8x128xf32>
    %22 = arith.addf %19, %21 : vector<8x128xf32>
    %c0_17 = arith.constant 0 : index
    %c0_18 = arith.constant 0 : index
    %23 = vector.load %arg8[%c0_17, %c0_18] : memref<8x128xf32, #tpu.memory_space<vmem>>, vector<8x128xf32>
    tpu.vector_store %arg8[%c0_17, %c0_18], %22 {strides = array<i32>} : memref<8x128xf32, #tpu.memory_space<vmem>>, vector<8x128xf32>,
    return
  }
  func.func @transform_0(%arg0: i32) -> (i32, i32) {
    %c0_i32 = arith.constant 0 : i32
    %c0_i32_0 = arith.constant 0 : i32
    return %arg0, %c0_i32 : i32, i32
  }
  func.func @transform_1(%arg0: i32) -> (i32, i32) {
    %c0_i32 = arith.constant 0 : i32
    %c0_i32_0 = arith.constant 0 : i32
    %c0_i32_1 = arith.constant 0 : i32
    return %c0_i32, %c0_i32_0 : i32, i32
  }
  func.func @transform_2(%arg0: i32) -> (i32, i32) {
    %c0_i32 = arith.constant 0 : i32
    %c0_i32_0 = arith.constant 0 : i32
    %c0_i32_1 = arith.constant 0 : i32
    return %c0_i32, %c0_i32_0 : i32, i32
  }
  func.func @transform_3(%arg0: i32) -> (i32, i32) {
    %c0_i32 = arith.constant 0 : i32
    %c0_i32_0 = arith.constant 0 : i32
    %c0_i32_1 = arith.constant 0 : i32
    return %c0_i32, %c0_i32_0 : i32, i32
  }
  func.func @transform_4(%arg0: i32) -> (i32, i32) {
    %c0_i32 = arith.constant 0 : i32
    %c0_i32_0 = arith.constant 0 : i32
    %c0_i32_1 = arith.constant 0 : i32
    return %c0_i32, %c0_i32_0 : i32, i32
  }
  func.func @transform_5(%arg0: i32) -> (i32, i32) {
    %c0_i32 = arith.constant 0 : i32
    %c0_i32_0 = arith.constant 0 : i32
    %c0_i32_1 = arith.constant 0 : i32
    return %c0_i32, %c0_i32_0 : i32, i32
  }
  func.func @transform_6(%arg0: i32) -> (i32, i32) {
    %c0_i32 = arith.constant 0 : i32
    %c0_i32_0 = arith.constant 0 : i32
    %c0_i32_1 = arith.constant 0 : i32
    return %c0_i32, %c0_i32_0 : i32, i32
  }
  func.func @transform_7(%arg0: i32) -> (i32, i32) {
    %c0_i32 = arith.constant 0 : i32
    %c0_i32_0 = arith.constant 0 : i32
    return %arg0, %c0_i32 : i32, i32
  }
}

</mosaic_0001>

<bundles_post_ra>
// kernel: tpu_custom_call.1
= control target key start
LH: loop header
LB: loop body
LE: loop exit
PB: predicated region body
PF: predicated region fallthrough
CT: control target
= control target key end

     0   :  { %12 = vsyncpa [#allocation3], 0  ;;  %s601_s0 = inlined_call_operand.hbm [shape: f32[8,16], index: 0, kind: input, shape index: {}]   ;;  %s602_s1 = inlined_call_operand.hbm [shape: bf16[16,128], index: 1, kind: input, shape index: {}]   ;;  %s603_s2 = inlined_call_operand.vmem [shape: f32[1,128], index: 2, kind: input, shape index: {}]   ;;  %s604_s3 = inlined_call_operand.hbm [shape: bf16[128,128], index: 3, kind: input, shape index: {}]   ;;  %s605_s4 = inlined_call_operand.vmem [shape: f32[1,128], index: 4, kind: input, shape index: {}]   ;;  %s606_s5 = inlined_call_operand.hbm [shape: bf16[128,128], index: 5, kind: input, shape index: {}]   ;;  %s607_s6 = inlined_call_operand.vmem [shape: f32[1,128], index: 6, kind: input, shape index: {}]   ;;  %s608_s7 = inlined_call_operand.hbm [shape: f32[8,128], index: 7, kind: output, shape index: {}]  }
   0x1   :  { %13 = vsyncpa [#allocation6], 0 }
   0x2   :  { %14 = vsyncpa [#allocation9], 0  ;;  %s31_s26 = sshll.u32 %s602_s1, 4  ;;  %s32_s26 = int_to_ptr.hbm [resolvable:$true] %s31_s26 }
   0x3   :  { %15 = vsyncpa [#allocation4], 0  ;;  %s530_s27 = smov [#allocation5]   ;;  %s21_s8 = sshll.u32 %s601_s0, 4  ;;  %s22_s8 = int_to_ptr.hbm [resolvable:$true] %s21_s8 }
   0x4   :  { %s33_s28 = sshll.u32 %s530_s27, 4  ;;  %s531_s9 = smov 64   ;;  %s34_s28 = int_to_ptr.vmem [resolvable:$true] %s33_s28 }
   0x5   :  { %s532_s10 = smov 4   ;;  %s533_s11 = smov [#allocation2]  }
   0x6   :  { %39 = dma.hbm_to_vmem [thread:$0]  %s32_s26, 128, %s34_s28, [#allocation6], %s531_s9, %s531_s9, %s532_s10  }
   0x7   :  { %s23_s12 = sshll.u32 %s533_s11, 4  ;;  %s46_s15 = sshll.u32 %s604_s3, 4  ;;  %s24_s12 = int_to_ptr.vmem [resolvable:$true] %s23_s12  ;;  %s47_s15 = int_to_ptr.hbm [resolvable:$true] %s46_s15 }
   0x8   :  { %26 = dma.hbm_to_vmem [thread:$0]  %s22_s8, 128, %s24_s12, [#allocation3]  }
   0x9   :  { %s61_s17 = sshll.u32 %s606_s5, 4  ;;  %s534_s18 = smov [#allocation7]   ;;  %s62_s17 = int_to_ptr.hbm [resolvable:$true] %s61_s17 }
   0xa   :  { %s48_s19 = sshll.u32 %s534_s18, 4  ;;  %s535_s0 = smov [#allocation8]   ;;  %s49_s19 = int_to_ptr.vmem [resolvable:$true] %s48_s19 }
   0xb   :  { %54 = dma.hbm_to_vmem [thread:$0]  %s47_s15, 1024, %s49_s19, [#allocation6], %s531_s9, %s531_s9, %s532_s10  }
   0xc   :  { %s63_s20 = sshll.u32 %s535_s0, 4  ;;  %s64_s20 = int_to_ptr.vmem [resolvable:$true] %s63_s20 }
   0xd   :  { %69 = dma.hbm_to_vmem [thread:$0]  %s62_s17, 1024, %s64_s20, [#allocation9], %s531_s9, %s531_s9, %s532_s10  }
   0xe   :  { %522 = dma.done.wait [#allocation3], 128  }
   0xf   :  { %523 = vsyncadd [#allocation3], 4294967168 }
  0x10   :  { %524 = dma.done.wait [#allocation6], 1152  }
  0x11   :  { %525 = vsyncadd [#allocation6], 4294966144 }
  0x12   :  { %526 = dma.done.wait [#allocation9], 1024  }
  0x13   :  { %527 = vsyncadd [#allocation9], 4294966272  ;;  %v375_v0 = vld [vmem:[#allocation5] sm:$0xff]  ;;  %v89_v1 = vld [vmem:[#allocation2] sm:$0xff]  ;;  %vm103_vm0 = vcmask 130048   ;;  %s536_s24 = smov [#allocation10]  }
  0x14   :  { %v383_v2 = vld [vmem:[#allocation7 + $0x38] sm:$0xff]  ;;  %v90_v3 = vpack.c.bf16 %v89_v1, %v89_v1  ;;  %114 = vmatpush.bf16.msra.mxu0 %v375_v0  ;;  %v382_v4 = vld [vmem:[#allocation7 + $0x30] sm:$0xff]  ;;  %v381_v5 = vld [vmem:[#allocation7 + $0x28] sm:$0xff]  ;;  %s292_s25 = sshll.u32 %s536_s24, 4  ;;  %s294_s28 = sshll.u32 %s608_s7, 4  ;;  %s293_s25 = int_to_ptr.vmem [resolvable:$true] %s292_s25  ;;  %s295_s28 = int_to_ptr.hbm [resolvable:$true] %s294_s28 }
  0x15   :  { %190 = vmatpush.bf16.msra.mxu1 %v383_v2  ;;  %v380_v6 = vld [vmem:[#allocation7 + $0x20] sm:$0xff]  ;;  %v379_v7 = vld [vmem:[#allocation7 + $0x18] sm:$0xff]  ;;  %v378_v8 = vld [vmem:[#allocation7 + $0x10] sm:$0xff] }
  0x16   :  { %v377_v9 = vld [vmem:[#allocation7 + $0x8] sm:$0xff]  ;;  %v376_v10 = vld [vmem:[#allocation7] sm:$0xff]  ;;  %v391_v11 = vld [vmem:[#allocation8 + $0x38] sm:$0xff] }
  0x17   :  { %310 = vmatmul.msk.bf16.vlgmr.msra.gmra.mxu0 %vm103_vm0, %v90_v3  ;;  %273 = vmatpush.bf16.msra.mxu2 %v391_v11  ;;  %v390_v12 = vld [vmem:[#allocation8 + $0x30] sm:$0xff]  ;;  %v389_v13 = vld [vmem:[#allocation8 + $0x28] sm:$0xff]  ;;  %v388_v14 = vld [vmem:[#allocation8 + $0x20] sm:$0xff] }
  0x18   :  { %v387_v15 = vld [vmem:[#allocation8 + $0x18] sm:$0xff]  ;;  %v386_v16 = vld [vmem:[#allocation8 + $0x10] sm:$0xff]  ;;  %v385_v23 = vld [vmem:[#allocation8 + $0x8] sm:$0xff] }
  0x19   :  { %191 = vmatpush.bf16.msra.mxu1 %v382_v4  ;;  %v399_v17 = vld [vmem:[%s603_s2] ss:$0 sm:$0xff]  ;;  %v384_v24 = vld [vmem:[#allocation8] sm:$0xff] }
  0x1a   :  { %v400_v25 = vld [vmem:[%s605_s4] ss:$0 sm:$0xff] }
  0x1b   :  { %274 = vmatpush.bf16.msra.mxu2 %v390_v12  ;;  %v401_v31 = vld [vmem:[%s607_s6] ss:$0 sm:$0xff] }
  0x1d   :  { %192 = vmatpush.bf16.msra.mxu1 %v381_v5 }
  0x1f   :  { %275 = vmatpush.bf16.msra.mxu2 %v389_v13 }
  0x21   :  { %193 = vmatpush.bf16.msra.mxu1 %v380_v6 }
  0x23   :  { %276 = vmatpush.bf16.msra.mxu2 %v388_v14 }
  0x25   :  { %194 = vmatpush.bf16.msra.mxu1 %v379_v7 }
  0x27   :  { %277 = vmatpush.bf16.msra.mxu2 %v387_v15 }
  0x29   :  { %195 = vmatpush.bf16.msra.mxu1 %v378_v8 }
  0x2b   :  { %278 = vmatpush.bf16.msra.mxu2 %v386_v16 }
  0x2d   :  { %196 = vmatpush.bf16.msra.mxu1 %v377_v9 }
  0x2f   :  { %279 = vmatpush.bf16.msra.mxu2 %v385_v23 }
  0x31   :  { %197 = vmatpush.bf16.msra.mxu1 %v376_v10 }
  0x33   :  { %280 = vmatpush.bf16.msra.mxu2 %v384_v24 }
  0x94   :  { %v116_v18 = vpop.f32.mrf.mxu0 }
  0x95   :  { %v117_v19 = vadd.f32 %v399_v17, %v116_v18 }
  0x97   :  { %v120_v20 = vmax.f32 %v117_v19, 0.0 }
  0x99   :  { %v121_v21 = vpack.c.bf16 %v120_v20, %v120_v20 }
  0x9b   :  { %198 = vmatmul.bf16.vlgmr.msra.gmra.mxu1 %v121_v21 }
  0x9c   :  { %v118_v22 = vpop.f32.mrf.mxu0 }
 0x118   :  { %v199_v26 = vpop.f32.mrf.mxu1 }
 0x119   :  { %v200_v27 = vadd.f32 %v400_v25, %v199_v26 }
 0x11b   :  { %v203_v28 = vmax.f32 %v200_v27, 0.0 }
 0x11d   :  { %v204_v29 = vpack.c.bf16 %v203_v28, %v203_v28 }
 0x11f   :  { %281 = vmatmul.bf16.vlgmr.msra.gmra.mxu2 %v204_v29 }
 0x120   :  { %v201_v30 = vpop.f32.mrf.mxu1 }
 0x1a2   :  { %v282_v32 = vpop.f32.mrf.mxu2 }
 0x1a3   :  { %v283_v33 = vadd.f32 %v401_v31, %v282_v32 }
 0x1a5   :  { %286 = vst [vmem:[#allocation10] sm:$0xff] %v283_v33 }
 0x1a6   :  { %297 = dma.vmem_to_hbm [thread:$0]  %s293_s25, 128, %s295_s28, [#allocation4]  }
 0x1aa   :  { %v284_v34 = vpop.f32.mrf.mxu2 }
 0x1ab   :  { %528 = dma.done.wait [#allocation4], 128  }
 0x1ac   :  { %529 = vsyncadd [#allocation4], 4294967168 }
 0x1ad   :  { %302 = vsyncpa [#allocation3], 1 }
 0x1ae   :  { %303 = vsyncpa [#allocation6], 1 }
 0x1af   :  { %304 = vsyncpa [#allocation9], 1 }
 0x1b0   :  { %305 = vsyncpa [#allocation4], 1 }

// kernel: tpu_custom_call.1
= control target key start
LH: loop header
LB: loop body
LE: loop exit
PB: predicated region body
PF: predicated region fallthrough
CT: control target
= control target key end

     0   :  { %12 = vsyncpa [#allocation3], 0  ;;  %s601_s0 = inlined_call_operand.hbm [shape: f32[8,16], index: 0, kind: input, shape index: {}]   ;;  %s602_s1 = inlined_call_operand.hbm [shape: bf16[16,128], index: 1, kind: input, shape index: {}]   ;;  %s603_s2 = inlined_call_operand.vmem [shape: f32[1,128], index: 2, kind: input, shape index: {}]   ;;  %s604_s3 = inlined_call_operand.hbm [shape: bf16[128,128], index: 3, kind: input, shape index: {}]   ;;  %s605_s4 = inlined_call_operand.vmem [shape: f32[1,128], index: 4, kind: input, shape index: {}]   ;;  %s606_s5 = inlined_call_operand.hbm [shape: bf16[128,128], index: 5, kind: input, shape index: {}]   ;;  %s607_s6 = inlined_call_operand.vmem [shape: f32[1,128], index: 6, kind: input, shape index: {}]   ;;  %s608_s7 = inlined_call_operand.hbm [shape: f32[8,128], index: 7, kind: output, shape index: {}]  }
   0x1   :  { %13 = vsyncpa [#allocation6], 0 }
   0x2   :  { %14 = vsyncpa [#allocation9], 0  ;;  %s31_s26 = sshll.u32 %s602_s1, 4  ;;  %s32_s26 = int_to_ptr.hbm [resolvable:$true] %s31_s26 }
   0x3   :  { %15 = vsyncpa [#allocation4], 0  ;;  %s530_s27 = smov [#allocation5]   ;;  %s21_s8 = sshll.u32 %s601_s0, 4  ;;  %s22_s8 = int_to_ptr.hbm [resolvable:$true] %s21_s8 }
   0x4   :  { %s33_s28 = sshll.u32 %s530_s27, 4  ;;  %s531_s9 = smov 64   ;;  %s34_s28 = int_to_ptr.vmem [resolvable:$true] %s33_s28 }
   0x5   :  { %s532_s10 = smov 4   ;;  %s533_s11 = smov [#allocation2]  }
   0x6   :  { %39 = dma.hbm_to_vmem [thread:$0]  %s32_s26, 128, %s34_s28, [#allocation6], %s531_s9, %s531_s9, %s532_s10  }
   0x7   :  { %s23_s12 = sshll.u32 %s533_s11, 4  ;;  %s46_s15 = sshll.u32 %s604_s3, 4  ;;  %s24_s12 = int_to_ptr.vmem [resolvable:$true] %s23_s12  ;;  %s47_s15 = int_to_ptr.hbm [resolvable:$true] %s46_s15 }
   0x8   :  { %26 = dma.hbm_to_vmem [thread:$0]  %s22_s8, 128, %s24_s12, [#allocation3]  }
   0x9   :  { %s61_s17 = sshll.u32 %s606_s5, 4  ;;  %s534_s18 = smov [#allocation7]   ;;  %s62_s17 = int_to_ptr.hbm [resolvable:$true] %s61_s17 }
   0xa   :  { %s48_s19 = sshll.u32 %s534_s18, 4  ;;  %s535_s0 = smov [#allocation8]   ;;  %s49_s19 = int_to_ptr.vmem [resolvable:$true] %s48_s19 }
   0xb   :  { %54 = dma.hbm_to_vmem [thread:$0]  %s47_s15, 1024, %s49_s19, [#allocation6], %s531_s9, %s531_s9, %s532_s10  }
   0xc   :  { %s63_s20 = sshll.u32 %s535_s0, 4  ;;  %s64_s20 = int_to_ptr.vmem [resolvable:$true] %s63_s20 }
   0xd   :  { %69 = dma.hbm_to_vmem [thread:$0]  %s62_s17, 1024, %s64_s20, [#allocation9], %s531_s9, %s531_s9, %s532_s10  }
   0xe   :  { %522 = dma.done.wait [#allocation3], 128  }
   0xf   :  { %523 = vsyncadd [#allocation3], 4294967168 }
  0x10   :  { %524 = dma.done.wait [#allocation6], 1152  }
  0x11   :  { %525 = vsyncadd [#allocation6], 4294966144 }
  0x12   :  { %526 = dma.done.wait [#allocation9], 1024  }
  0x13   :  { %527 = vsyncadd [#allocation9], 4294966272  ;;  %v375_v0 = vld [vmem:[#allocation5] sm:$0xff]  ;;  %v89_v1 = vld [vmem:[#allocation2] sm:$0xff]  ;;  %vm103_vm0 = vcmask 130048   ;;  %s536_s24 = smov [#allocation10]  }
  0x14   :  { %v383_v2 = vld [vmem:[#allocation7 + $0x38] sm:$0xff]  ;;  %v90_v3 = vpack.c.bf16 %v89_v1, %v89_v1  ;;  %114 = vmatpush.bf16.msra.mxu0 %v375_v0  ;;  %v382_v4 = vld [vmem:[#allocation7 + $0x30] sm:$0xff]  ;;  %v381_v5 = vld [vmem:[#allocation7 + $0x28] sm:$0xff]  ;;  %s292_s25 = sshll.u32 %s536_s24, 4  ;;  %s294_s28 = sshll.u32 %s608_s7, 4  ;;  %s293_s25 = int_to_ptr.vmem [resolvable:$true] %s292_s25  ;;  %s295_s28 = int_to_ptr.hbm [resolvable:$true] %s294_s28 }
  0x15   :  { %190 = vmatpush.bf16.msra.mxu1 %v383_v2  ;;  %v380_v6 = vld [vmem:[#allocation7 + $0x20] sm:$0xff]  ;;  %v379_v7 = vld [vmem:[#allocation7 + $0x18] sm:$0xff]  ;;  %v378_v8 = vld [vmem:[#allocation7 + $0x10] sm:$0xff] }
  0x16   :  { %v377_v9 = vld [vmem:[#allocation7 + $0x8] sm:$0xff]  ;;  %v376_v10 = vld [vmem:[#allocation7] sm:$0xff]  ;;  %v391_v11 = vld [vmem:[#allocation8 + $0x38] sm:$0xff] }
  0x17   :  { %310 = vmatmul.msk.bf16.vlgmr.msra.gmra.mxu0 %vm103_vm0, %v90_v3  ;;  %273 = vmatpush.bf16.msra.mxu2 %v391_v11  ;;  %v390_v12 = vld [vmem:[#allocation8 + $0x30] sm:$0xff]  ;;  %v389_v13 = vld [vmem:[#allocation8 + $0x28] sm:$0xff]  ;;  %v388_v14 = vld [vmem:[#allocation8 + $0x20] sm:$0xff] }
  0x18   :  { %v387_v15 = vld [vmem:[#allocation8 + $0x18] sm:$0xff]  ;;  %v386_v16 = vld [vmem:[#allocation8 + $0x10] sm:$0xff]  ;;  %v385_v23 = vld [vmem:[#allocation8 + $0x8] sm:$0xff] }
  0x19   :  { %191 = vmatpush.bf16.msra.mxu1 %v382_v4  ;;  %v399_v17 = vld [vmem:[%s603_s2] ss:$0 sm:$0xff]  ;;  %v384_v24 = vld [vmem:[#allocation8] sm:$0xff] }
  0x1a   :  { %v400_v25 = vld [vmem:[%s605_s4] ss:$0 sm:$0xff] }
  0x1b   :  { %274 = vmatpush.bf16.msra.mxu2 %v390_v12  ;;  %v401_v31 = vld [vmem:[%s607_s6] ss:$0 sm:$0xff] }
  0x1d   :  { %192 = vmatpush.bf16.msra.mxu1 %v381_v5 }
  0x1f   :  { %275 = vmatpush.bf16.msra.mxu2 %v389_v13 }
  0x21   :  { %193 = vmatpush.bf16.msra.mxu1 %v380_v6 }
  0x23   :  { %276 = vmatpush.bf16.msra.mxu2 %v388_v14 }
  0x25   :  { %194 = vmatpush.bf16.msra.mxu1 %v379_v7 }
  0x27   :  { %277 = vmatpush.bf16.msra.mxu2 %v387_v15 }
  0x29   :  { %195 = vmatpush.bf16.msra.mxu1 %v378_v8 }
  0x2b   :  { %278 = vmatpush.bf16.msra.mxu2 %v386_v16 }
  0x2d   :  { %196 = vmatpush.bf16.msra.mxu1 %v377_v9 }
  0x2f   :  { %279 = vmatpush.bf16.msra.mxu2 %v385_v23 }
  0x31   :  { %197 = vmatpush.bf16.msra.mxu1 %v376_v10 }
  0x33   :  { %280 = vmatpush.bf16.msra.mxu2 %v384_v24 }
  0x94   :  { %v116_v18 = vpop.f32.mrf.mxu0 }
  0x95   :  { %v117_v19 = vadd.f32 %v399_v17, %v116_v18 }
  0x97   :  { %v120_v20 = vmax.f32 %v117_v19, 0.0 }
  0x99   :  { %v121_v21 = vpack.c.bf16 %v120_v20, %v120_v20 }
  0x9b   :  { %198 = vmatmul.bf16.vlgmr.msra.gmra.mxu1 %v121_v21 }
  0x9c   :  { %v118_v22 = vpop.f32.mrf.mxu0 }
 0x118   :  { %v199_v26 = vpop.f32.mrf.mxu1 }
 0x119   :  { %v200_v27 = vadd.f32 %v400_v25, %v199_v26 }
 0x11b   :  { %v203_v28 = vmax.f32 %v200_v27, 0.0 }
 0x11d   :  { %v204_v29 = vpack.c.bf16 %v203_v28, %v203_v28 }
 0x11f   :  { %281 = vmatmul.bf16.vlgmr.msra.gmra.mxu2 %v204_v29 }
 0x120   :  { %v201_v30 = vpop.f32.mrf.mxu1 }
 0x1a2   :  { %v282_v32 = vpop.f32.mrf.mxu2 }
 0x1a3   :  { %v283_v33 = vadd.f32 %v401_v31, %v282_v32 }
 0x1a5   :  { %286 = vst [vmem:[#allocation10] sm:$0xff] %v283_v33 }
 0x1a6   :  { %297 = dma.vmem_to_hbm [thread:$0]  %s293_s25, 128, %s295_s28, [#allocation4]  }
 0x1aa   :  { %v284_v34 = vpop.f32.mrf.mxu2 }
 0x1ab   :  { %528 = dma.done.wait [#allocation4], 128  }
 0x1ac   :  { %529 = vsyncadd [#allocation4], 4294967168 }
 0x1ad   :  { %302 = vsyncpa [#allocation3], 1 }
 0x1ae   :  { %303 = vsyncpa [#allocation6], 1 }
 0x1af   :  { %304 = vsyncpa [#allocation9], 1 }
 0x1b0   :  { %305 = vsyncpa [#allocation4], 1 }

</bundles_post_ra>
